<compile_context>
chip_gen: v7x
topology: tpu7x:2x2x1
jax: 0.10.0
libtpu: 0.0.40
codegen_flags: <defaults>
</compile_context>

<pallas_src>
import functools

import jax
import jax.numpy as jnp
from jax.experimental import pallas as pl
from jax.experimental.pallas import tpu as pltpu


def _round_up(x, m):
    return (x + m - 1) // m * m


def _mhead_attention_kernel(x_ref,      # (bb, tT, C)    bf16
                            w_ref,      # (C, 2*HO_pad)  bf16  [att cols | cla cols]
                            b_ref,      # (1, 2*HO_pad)  f32
                            out_ref,    # (bb, HO_pad)   f32   ratio = S(att*cla)/S(att)
                            s_att_ref,  # (bb, HO_pad)   f32 scratch  (S att)
                            s_ac_ref,   # (bb, HO_pad)   f32 scratch  (S att*cla)
                            *, t_total, need_mask):
    t_idx = pl.program_id(1)

    @pl.when(t_idx == 0)
    def _init():
        s_att_ref[...] = jnp.zeros_like(s_att_ref)
        s_ac_ref[...] = jnp.zeros_like(s_ac_ref)

    bb, tT, c = x_ref.shape
    ho_pad = out_ref.shape[-1]

    # One wide MXU pass for every head's att & cla 1x1-conv (bf16 in, f32 acc).
    x2 = x_ref[...].reshape(bb * tT, c)
    y = jnp.dot(x2, w_ref[...], preferred_element_type=jnp.float32)
    # sigmoid(z) == 0.5*(tanh(z/2)+1): a single EUP transcendental per element.
    y = 0.5 * jnp.tanh(0.5 * (y + b_ref[...])) + 0.5
    y = y.reshape(bb, tT, 2 * ho_pad)

    att = y[:, :, :ho_pad]          # lane-aligned slices (ho_pad % 128 == 0)
    cla = y[:, :, ho_pad:]
    eps = 1e-7
    att = jnp.clip(att, eps, 1.0 - eps)

    if need_mask:
        # Zero contributions from zero-padded time frames (only when T%tT != 0).
        pos = t_idx * tT + jax.lax.broadcasted_iota(jnp.int32, (1, tT, 1), 1)
        att = jnp.where(pos < t_total, att, 0.0)

    # Running sums over time; the normalization only needs these two.
    s_att_ref[...] += jnp.sum(att, axis=1)
    s_ac_ref[...] += jnp.sum(att * cla, axis=1)

    @pl.when(t_idx == pl.num_programs(1) - 1)
    def _finalize():
        #  S(att*cla) / S(att)  via EUP approximate reciprocal (no vector divide).
        out_ref[...] = s_ac_ref[...] * pl.reciprocal(s_att_ref[...], approx=True)


def mhead_attention_pallas(x, params, *, interpret=False):
    """MHeadAttention.forward as one fused Pallas TPU kernel.

    x: (B, n_in, T, 1) float32  (samples, freq_bins/channels, time_steps, 1)
    params:
      att_w, cla_w: (head_num, n_out, n_in)   1x1-conv kernels (spatial squeezed)
      att_b, cla_b: (head_num, n_out)
      head_weight:  (head_num,)
    Returns (out, []) exactly like the PyTorch module; out: (B, n_out) float32.
    """
    B, C, T, last = x.shape
    assert last == 1, "expected trailing spatial dim of size 1"
    head_num, O, Cw = params["att_w"].shape
    assert Cw == C

    HO = head_num * O
    HO_pad = _round_up(HO, 128)        # one 128-pad per GROUP, not per head
    N = 2 * HO_pad

    # ---- wrapper glue (cheap, one-off, XLA-side) ----------------------------
    # Fused weight: columns [att h0..hH-1 (dense) | pad][cla h0..hH-1 | pad].
    def pack_w(w):                     # (H, O, C) -> (C, HO_pad)
        w2 = jnp.transpose(w, (2, 0, 1)).reshape(C, HO)
        return jnp.pad(w2, ((0, 0), (0, HO_pad - HO)))

    def pack_b(b):                     # (H, O) -> (HO_pad,)
        return jnp.pad(b.reshape(HO), ((0, HO_pad - HO),))

    w_fused = jnp.concatenate(
        [pack_w(params["att_w"]), pack_w(params["cla_w"])], axis=1
    ).astype(jnp.bfloat16)                                        # (C, N)
    b_fused = jnp.concatenate(
        [pack_b(params["att_b"]), pack_b(params["cla_b"])], axis=0
    ).reshape(1, N).astype(jnp.float32)                           # (1, N)
    head_w = params["head_weight"].astype(jnp.float32)

    # (B, C, T, 1) -> (B, T, C), bf16: positions on sublanes, channels on lanes.
    # Transpose + cast + pad are left to XLA's prologue fusion.
    x_btc = jnp.transpose(x[:, :, :, 0], (0, 2, 1)).astype(jnp.bfloat16)

    # ---- tiling --------------------------------------------------------------
    bb = min(B, 8)
    B_pad = _round_up(B, bb)

    # Bound the in-kernel f32 (bb, tT, N) slab to ~12 MiB (v7x-safe) and aim for
    # matmul M = bb*tT >= 256 when T allows (v6e/v7x MXU width).
    slab_budget = 12 * 2 ** 20
    tT_cap = max(8, min(512, (slab_budget // max(1, bb * N * 4)) // 8 * 8))
    tT = min(_round_up(T, 8), tT_cap)
    T_pad = _round_up(T, tT)

    pad_b_rows = B_pad - B
    pad_t_rows = T_pad - T
    if pad_b_rows or pad_t_rows:
        x_btc = jnp.pad(x_btc, ((0, pad_b_rows), (0, pad_t_rows), (0, 0)))

    # ---- VMEM budget (corrected accounting) ----------------------------------
    est = (2 * bb * tT * C * 2         # activation tile, bf16, double-buffered
           + C * N * 2                 # fused weight, bf16, single-buffered
           + N * 4                     # fused bias, f32
           + 2 * bb * HO_pad * 4       # output tile, f32, double-buffered
           + 2 * bb * HO_pad * 4       # two f32 scratch accumulators
           + 3 * bb * tT * N * 4)      # in-kernel f32 y + att/cla temporaries
    try:
        phys_vmem = getattr(pltpu.get_tpu_info(), "vmem_capacity_bytes",
                            64 * 2 ** 20)
    except Exception:
        phys_vmem = 64 * 2 ** 20       # conservative (v7x-sized) fallback
    vmem_cap = int(phys_vmem * 4 // 5)
    vmem_limit = int(min(vmem_cap, max(16 * 2 ** 20, int(1.5 * est))))

    kernel = functools.partial(_mhead_attention_kernel,
                               t_total=T, need_mask=(T_pad != T))

    def _call(single_buffer_weights):
        # Grid-invariant weight/bias blocks: single-buffer them (their index_map
        # is constant, so double-buffering only wastes VMEM).
        extra = (dict(pipeline_mode=pl.Buffered(1))
                 if single_buffer_weights else {})
        grid_spec = pltpu.PrefetchScalarGridSpec(
            num_scalar_prefetch=0,
            grid=(B_pad // bb, T_pad // tT),          # (batch, time); time last
            in_specs=[
                pl.BlockSpec((bb, tT, C), lambda i, t: (i, t, 0)),     # acts
                pl.BlockSpec((C, N), lambda i, t: (0, 0), **extra),    # weight
                pl.BlockSpec((1, N), lambda i, t: (0, 0), **extra),    # bias
            ],
            out_specs=pl.BlockSpec((bb, HO_pad), lambda i, t: (i, 0)),
            scratch_shapes=[pltpu.VMEM((bb, HO_pad), jnp.float32),
                            pltpu.VMEM((bb, HO_pad), jnp.float32)],
        )
        return pl.pallas_call(
            kernel,
            out_shape=jax.ShapeDtypeStruct((B_pad, HO_pad), jnp.float32),
            grid_spec=grid_spec,
            compiler_params=pltpu.CompilerParams(
                dimension_semantics=("parallel", "arbitrary"),
                vmem_limit_bytes=vmem_limit),
            interpret=interpret,
        )(x_btc, w_fused, b_fused)

    try:
        ratio_pad = jax.block_until_ready(_call(True))
    except Exception:
        # Fallback if this JAX build rejects pl.Buffered(1): identical kernel,
        # default (double) buffering for the grid-invariant blocks.
        ratio_pad = _call(False)

    # Tiny XLA epilogue: per-head head-weight scaling + head sum on (B, H, O).
    ratio = ratio_pad[:B, :HO].reshape(B, head_num, O)
    out = jnp.sum(ratio * head_w[None, :, None], axis=1)
    return out, []                      # PyTorch module returns (x, [])


def reference(x, params):
    """Pure-JAX f32 reference reproducing the PyTorch forward literally."""
    head_num = params["att_w"].shape[0]
    outs = []
    for i in range(head_num):
        wa, ba = params["att_w"][i], params["att_b"][i]
        wc, bc = params["cla_w"][i], params["cla_b"][i]
        att = jax.nn.sigmoid(jnp.einsum("oc,bctl->botl", wa, x)
                             + ba[None, :, None, None])
        cla = jax.nn.sigmoid(jnp.einsum("oc,bctl->botl", wc, x)
                             + bc[None, :, None, None])
        att = att[:, :, :, 0]
        cla = cla[:, :, :, 0]
        att = jnp.clip(att, 1e-7, 1.0 - 1e-7)
        norm_att = att / jnp.sum(att, axis=2)[:, :, None]
        outs.append(jnp.sum(norm_att * cla, axis=2) * params["head_weight"][i])
    return jnp.stack(outs, axis=0).sum(axis=0)


if __name__ == "__main__":
    # Small shapes consistent with the module's (samples, freq_bins, time, 1) input.
    B, n_in, T, n_out, head_num = 2, 32, 16, 16, 4

    key = jax.random.PRNGKey(0)
    k = jax.random.split(key, 6)
    x = jax.random.normal(k[0], (B, n_in, T, 1), dtype=jnp.float32)
    params = {
        "att_w": 0.1 * jax.random.normal(k[1], (head_num, n_out, n_in), jnp.float32),
        "att_b": 0.1 * jax.random.normal(k[2], (head_num, n_out), jnp.float32),
        "cla_w": 0.1 * jax.random.normal(k[3], (head_num, n_out, n_in), jnp.float32),
        "cla_b": 0.1 * jax.random.normal(k[4], (head_num, n_out), jnp.float32),
        "head_weight": jnp.full((head_num,), 1.0 / head_num, jnp.float32),
    }

    out, score = mhead_attention_pallas(x, params)
    out = jax.block_until_ready(out)

    ref = reference(x, params)
    assert out.shape == (B, n_out), out.shape
    assert score == []
    max_err = float(jnp.max(jnp.abs(out - ref)))
    # bf16 matmul operands + approx reciprocal -> relaxed (but tight) tolerance.
    assert jnp.allclose(out, ref, atol=1e-2, rtol=1e-2), max_err
    print("KERNEL_OK")
</pallas_src>

<mosaic_0001>
module attributes {stable_mosaic.version = 11 : i64} {
  func.func @_mhead_attention_kernel(%arg0: i32, %arg1: i32, %arg2: memref<2x16x32xbf16, #tpu.memory_space<vmem>>, %arg3: memref<32x256xbf16, #tpu.memory_space<vmem>>, %arg4: memref<1x256xf32, #tpu.memory_space<vmem>>, %arg5: memref<2x128xf32, #tpu.memory_space<vmem>>, %arg6: memref<2x128xf32, #tpu.memory_space<vmem>>, %arg7: memref<2x128xf32, #tpu.memory_space<vmem>>) attributes {dimension_semantics = [#tpu.dimension_semantics<parallel>, #tpu.dimension_semantics<arbitrary>], iteration_bounds = array<i64: 1, 1>, scalar_prefetch = 0 : i64, scratch_operands = 2 : i64, tpu.core_type = #tpu.core_type<tc>, window_params = [{transform_indices = @transform_0, window_bounds = array<i64: 2, 16, 32>}, {pipeline_mode = #tpu.pipeline_mode<synchronous>, transform_indices = @transform_1, window_bounds = array<i64: 32, 256>}, {pipeline_mode = #tpu.pipeline_mode<synchronous>, transform_indices = @transform_2, window_bounds = array<i64: 1, 256>}, {transform_indices = @transform_3, window_bounds = array<i64: 2, 128>}]} {
    %c0_i32 = arith.constant 0 : i32
    %0 = arith.cmpi eq, %arg1, %c0_i32 : i32
    %1 = arith.extui %0 : i1 to i32
    %c0_i32_0 = arith.constant 0 : i32
    %2 = arith.cmpi ne, %1, %c0_i32_0 : i32
    scf.if %2 {
      %cst_24 = arith.constant 0.000000e+00 : f32
      %36 = vector.broadcast %cst_24 : f32 to vector<2x128xf32>
      %c0_25 = arith.constant 0 : index
      %c0_26 = arith.constant 0 : index
      %37 = vector.load %arg6[%c0_25, %c0_26] : memref<2x128xf32, #tpu.memory_space<vmem>>, vector<2x128xf32>
      tpu.vector_store %arg6[%c0_25, %c0_26], %36 {strides = array<i32>} : memref<2x128xf32, #tpu.memory_space<vmem>>, vector<2x128xf32>,
      %cst_27 = arith.constant 0.000000e+00 : f32
      %38 = vector.broadcast %cst_27 : f32 to vector<2x128xf32>
      %c0_28 = arith.constant 0 : index
      %c0_29 = arith.constant 0 : index
      %39 = vector.load %arg7[%c0_28, %c0_29] : memref<2x128xf32, #tpu.memory_space<vmem>>, vector<2x128xf32>
      tpu.vector_store %arg7[%c0_28, %c0_29], %38 {strides = array<i32>} : memref<2x128xf32, #tpu.memory_space<vmem>>, vector<2x128xf32>,
    } else {
    }
    %c0 = arith.constant 0 : index
    %c0_1 = arith.constant 0 : index
    %c0_2 = arith.constant 0 : index
    %3 = vector.load %arg2[%c0, %c0_1, %c0_2] : memref<2x16x32xbf16, #tpu.memory_space<vmem>>, vector<2x16x32xbf16>
    %4 = vector.shape_cast %3 : vector<2x16x32xbf16> to vector<32x32xbf16>
    %c0_3 = arith.constant 0 : index
    %c0_4 = arith.constant 0 : index
    %5 = vector.load %arg3[%c0_3, %c0_4] : memref<32x256xbf16, #tpu.memory_space<vmem>>, vector<32x256xbf16>
    %cst = arith.constant dense<0.000000e+00> : vector<32x256xf32>
    %6 = tpu.matmul %4, %5, %cst {dimension_numbers = #tpu.dot_dimension_numbers<[1], [0], [0], [1], [0, 0, 1, 1], [], []>} : vector<32x32xbf16>, vector<32x256xbf16>, vector<32x256xf32> -> vector<32x256xf32>
    %c0_5 = arith.constant 0 : index
    %c0_6 = arith.constant 0 : index
    %7 = vector.load %arg4[%c0_5, %c0_6] : memref<1x256xf32, #tpu.memory_space<vmem>>, vector<1x256xf32>
    %8 = vector.broadcast %7 : vector<1x256xf32> to vector<32x256xf32>
    %9 = arith.addf %6, %8 : vector<32x256xf32>
    %cst_7 = arith.constant 5.000000e-01 : f32
    %10 = vector.broadcast %cst_7 : f32 to vector<32x256xf32>
    %11 = arith.mulf %10, %9 : vector<32x256xf32>
    %12 = math.tanh %11 : vector<32x256xf32>
    %cst_8 = arith.constant 5.000000e-01 : f32
    %13 = vector.broadcast %cst_8 : f32 to vector<32x256xf32>
    %14 = arith.mulf %13, %12 : vector<32x256xf32>
    %cst_9 = arith.constant 5.000000e-01 : f32
    %15 = vector.broadcast %cst_9 : f32 to vector<32x256xf32>
    %16 = arith.addf %14, %15 : vector<32x256xf32>
    %17 = vector.shape_cast %16 : vector<32x256xf32> to vector<2x16x256xf32>
    %18 = vector.extract_strided_slice %17 {offsets = [0, 0, 0], sizes = [2, 16, 128], strides = [1, 1, 1]} : vector<2x16x256xf32> to vector<2x16x128xf32>
    %19 = vector.extract_strided_slice %17 {offsets = [0, 0, 128], sizes = [2, 16, 128], strides = [1, 1, 1]} : vector<2x16x256xf32> to vector<2x16x128xf32>
    %cst_10 = arith.constant 1.000000e-07 : f32
    %cst_11 = arith.constant 0.99999988 : f32
    %20 = vector.broadcast %cst_10 : f32 to vector<2x16x128xf32>
    %21 = arith.maximumf %20, %18 : vector<2x16x128xf32>
    %22 = vector.broadcast %cst_11 : f32 to vector<2x16x128xf32>
    %23 = arith.minimumf %22, %21 : vector<2x16x128xf32>
    %c0_12 = arith.constant 0 : index
    %c0_13 = arith.constant 0 : index
    %24 = vector.load %arg6[%c0_12, %c0_13] : memref<2x128xf32, #tpu.memory_space<vmem>>, vector<2x128xf32>
    %cst_14 = arith.constant dense<0.000000e+00> : vector<2x128xf32>
    %25 = vector.multi_reduction <add>, %23, %cst_14 [1] : vector<2x16x128xf32> to vector<2x128xf32>
    %26 = arith.addf %24, %25 : vector<2x128xf32>
    %c0_15 = arith.constant 0 : index
    %c0_16 = arith.constant 0 : index
    %27 = vector.load %arg6[%c0_15, %c0_16] : memref<2x128xf32, #tpu.memory_space<vmem>>, vector<2x128xf32>
    tpu.vector_store %arg6[%c0_15, %c0_16], %26 {strides = array<i32>} : memref<2x128xf32, #tpu.memory_space<vmem>>, vector<2x128xf32>,
    %c0_17 = arith.constant 0 : index
    %c0_18 = arith.constant 0 : index
    %28 = vector.load %arg7[%c0_17, %c0_18] : memref<2x128xf32, #tpu.memory_space<vmem>>, vector<2x128xf32>
    %29 = arith.mulf %23, %19 : vector<2x16x128xf32>
    %cst_19 = arith.constant dense<0.000000e+00> : vector<2x128xf32>
    %30 = vector.multi_reduction <add>, %29, %cst_19 [1] : vector<2x16x128xf32> to vector<2x128xf32>
    %31 = arith.addf %28, %30 : vector<2x128xf32>
    %c0_20 = arith.constant 0 : index
    %c0_21 = arith.constant 0 : index
    %32 = vector.load %arg7[%c0_20, %c0_21] : memref<2x128xf32, #tpu.memory_space<vmem>>, vector<2x128xf32>
    tpu.vector_store %arg7[%c0_20, %c0_21], %31 {strides = array<i32>} : memref<2x128xf32, #tpu.memory_space<vmem>>, vector<2x128xf32>,
    %c0_i32_22 = arith.constant 0 : i32
    %33 = arith.cmpi eq, %arg1, %c0_i32_22 : i32
    %34 = arith.extui %33 : i1 to i32
    %c0_i32_23 = arith.constant 0 : i32
    %35 = arith.cmpi ne, %34, %c0_i32_23 : i32
    scf.if %35 {
      %c0_24 = arith.constant 0 : index
      %c0_25 = arith.constant 0 : index
      %36 = vector.load %arg7[%c0_24, %c0_25] : memref<2x128xf32, #tpu.memory_space<vmem>>, vector<2x128xf32>
      %c0_26 = arith.constant 0 : index
      %c0_27 = arith.constant 0 : index
      %37 = vector.load %arg6[%c0_26, %c0_27] : memref<2x128xf32, #tpu.memory_space<vmem>>, vector<2x128xf32>
      %38 = tpu.reciprocal %37 {approx = true} : vector<2x128xf32> -> vector<2x128xf32>
      %39 = arith.mulf %36, %38 : vector<2x128xf32>
      %c0_28 = arith.constant 0 : index
      %c0_29 = arith.constant 0 : index
      %40 = vector.load %arg5[%c0_28, %c0_29] : memref<2x128xf32, #tpu.memory_space<vmem>>, vector<2x128xf32>
      tpu.vector_store %arg5[%c0_28, %c0_29], %39 {strides = array<i32>} : memref<2x128xf32, #tpu.memory_space<vmem>>, vector<2x128xf32>,
    } else {
    }
    return
  }
  func.func @transform_0(%arg0: i32, %arg1: i32) -> (i32, i32, i32) {
    %c0_i32 = arith.constant 0 : i32
    %c0_i32_0 = arith.constant 0 : i32
    return %arg0, %arg1, %c0_i32 : i32, i32, i32
  }
  func.func @transform_1(%arg0: i32, %arg1: i32) -> (i32, i32) {
    %c0_i32 = arith.constant 0 : i32
    %c0_i32_0 = arith.constant 0 : i32
    %c0_i32_1 = arith.constant 0 : i32
    return %c0_i32, %c0_i32_0 : i32, i32
  }
  func.func @transform_2(%arg0: i32, %arg1: i32) -> (i32, i32) {
    %c0_i32 = arith.constant 0 : i32
    %c0_i32_0 = arith.constant 0 : i32
    %c0_i32_1 = arith.constant 0 : i32
    return %c0_i32, %c0_i32_0 : i32, i32
  }
  func.func @transform_3(%arg0: i32, %arg1: i32) -> (i32, i32) {
    %c0_i32 = arith.constant 0 : i32
    %c0_i32_0 = arith.constant 0 : i32
    return %arg0, %c0_i32 : i32, i32
  }
}

module attributes {stable_mosaic.version = 11 : i64} {
  func.func @_mhead_attention_kernel(%arg0: i32, %arg1: i32, %arg2: memref<2x16x32xbf16, #tpu.memory_space<vmem>>, %arg3: memref<32x256xbf16, #tpu.memory_space<vmem>>, %arg4: memref<1x256xf32, #tpu.memory_space<vmem>>, %arg5: memref<2x128xf32, #tpu.memory_space<vmem>>, %arg6: memref<2x128xf32, #tpu.memory_space<vmem>>, %arg7: memref<2x128xf32, #tpu.memory_space<vmem>>) attributes {dimension_semantics = [#tpu.dimension_semantics<parallel>, #tpu.dimension_semantics<arbitrary>], iteration_bounds = array<i64: 1, 1>, scalar_prefetch = 0 : i64, scratch_operands = 2 : i64, tpu.core_type = #tpu.core_type<tc>, window_params = [{transform_indices = @transform_0, window_bounds = array<i64: 2, 16, 32>}, {pipeline_mode = #tpu.pipeline_mode<synchronous>, transform_indices = @transform_1, window_bounds = array<i64: 32, 256>}, {pipeline_mode = #tpu.pipeline_mode<synchronous>, transform_indices = @transform_2, window_bounds = array<i64: 1, 256>}, {transform_indices = @transform_3, window_bounds = array<i64: 2, 128>}]} {
    %c0_i32 = arith.constant 0 : i32
    %0 = arith.cmpi eq, %arg1, %c0_i32 : i32
    %1 = arith.extui %0 : i1 to i32
    %c0_i32_0 = arith.constant 0 : i32
    %2 = arith.cmpi ne, %1, %c0_i32_0 : i32
    scf.if %2 {
      %cst_24 = arith.constant 0.000000e+00 : f32
      %36 = vector.broadcast %cst_24 : f32 to vector<2x128xf32>
      %c0_25 = arith.constant 0 : index
      %c0_26 = arith.constant 0 : index
      %37 = vector.load %arg6[%c0_25, %c0_26] : memref<2x128xf32, #tpu.memory_space<vmem>>, vector<2x128xf32>
      tpu.vector_store %arg6[%c0_25, %c0_26], %36 {strides = array<i32>} : memref<2x128xf32, #tpu.memory_space<vmem>>, vector<2x128xf32>,
      %cst_27 = arith.constant 0.000000e+00 : f32
      %38 = vector.broadcast %cst_27 : f32 to vector<2x128xf32>
      %c0_28 = arith.constant 0 : index
      %c0_29 = arith.constant 0 : index
      %39 = vector.load %arg7[%c0_28, %c0_29] : memref<2x128xf32, #tpu.memory_space<vmem>>, vector<2x128xf32>
      tpu.vector_store %arg7[%c0_28, %c0_29], %38 {strides = array<i32>} : memref<2x128xf32, #tpu.memory_space<vmem>>, vector<2x128xf32>,
    } else {
    }
    %c0 = arith.constant 0 : index
    %c0_1 = arith.constant 0 : index
    %c0_2 = arith.constant 0 : index
    %3 = vector.load %arg2[%c0, %c0_1, %c0_2] : memref<2x16x32xbf16, #tpu.memory_space<vmem>>, vector<2x16x32xbf16>
    %4 = vector.shape_cast %3 : vector<2x16x32xbf16> to vector<32x32xbf16>
    %c0_3 = arith.constant 0 : index
    %c0_4 = arith.constant 0 : index
    %5 = vector.load %arg3[%c0_3, %c0_4] : memref<32x256xbf16, #tpu.memory_space<vmem>>, vector<32x256xbf16>
    %cst = arith.constant dense<0.000000e+00> : vector<32x256xf32>
    %6 = tpu.matmul %4, %5, %cst {dimension_numbers = #tpu.dot_dimension_numbers<[1], [0], [0], [1], [0, 0, 1, 1], [], []>} : vector<32x32xbf16>, vector<32x256xbf16>, vector<32x256xf32> -> vector<32x256xf32>
    %c0_5 = arith.constant 0 : index
    %c0_6 = arith.constant 0 : index
    %7 = vector.load %arg4[%c0_5, %c0_6] : memref<1x256xf32, #tpu.memory_space<vmem>>, vector<1x256xf32>
    %8 = vector.broadcast %7 : vector<1x256xf32> to vector<32x256xf32>
    %9 = arith.addf %6, %8 : vector<32x256xf32>
    %cst_7 = arith.constant 5.000000e-01 : f32
    %10 = vector.broadcast %cst_7 : f32 to vector<32x256xf32>
    %11 = arith.mulf %10, %9 : vector<32x256xf32>
    %12 = math.tanh %11 : vector<32x256xf32>
    %cst_8 = arith.constant 5.000000e-01 : f32
    %13 = vector.broadcast %cst_8 : f32 to vector<32x256xf32>
    %14 = arith.mulf %13, %12 : vector<32x256xf32>
    %cst_9 = arith.constant 5.000000e-01 : f32
    %15 = vector.broadcast %cst_9 : f32 to vector<32x256xf32>
    %16 = arith.addf %14, %15 : vector<32x256xf32>
    %17 = vector.shape_cast %16 : vector<32x256xf32> to vector<2x16x256xf32>
    %18 = vector.extract_strided_slice %17 {offsets = [0, 0, 0], sizes = [2, 16, 128], strides = [1, 1, 1]} : vector<2x16x256xf32> to vector<2x16x128xf32>
    %19 = vector.extract_strided_slice %17 {offsets = [0, 0, 128], sizes = [2, 16, 128], strides = [1, 1, 1]} : vector<2x16x256xf32> to vector<2x16x128xf32>
    %cst_10 = arith.constant 1.000000e-07 : f32
    %cst_11 = arith.constant 0.99999988 : f32
    %20 = vector.broadcast %cst_10 : f32 to vector<2x16x128xf32>
    %21 = arith.maximumf %20, %18 : vector<2x16x128xf32>
    %22 = vector.broadcast %cst_11 : f32 to vector<2x16x128xf32>
    %23 = arith.minimumf %22, %21 : vector<2x16x128xf32>
    %c0_12 = arith.constant 0 : index
    %c0_13 = arith.constant 0 : index
    %24 = vector.load %arg6[%c0_12, %c0_13] : memref<2x128xf32, #tpu.memory_space<vmem>>, vector<2x128xf32>
    %cst_14 = arith.constant dense<0.000000e+00> : vector<2x128xf32>
    %25 = vector.multi_reduction <add>, %23, %cst_14 [1] : vector<2x16x128xf32> to vector<2x128xf32>
    %26 = arith.addf %24, %25 : vector<2x128xf32>
    %c0_15 = arith.constant 0 : index
    %c0_16 = arith.constant 0 : index
    %27 = vector.load %arg6[%c0_15, %c0_16] : memref<2x128xf32, #tpu.memory_space<vmem>>, vector<2x128xf32>
    tpu.vector_store %arg6[%c0_15, %c0_16], %26 {strides = array<i32>} : memref<2x128xf32, #tpu.memory_space<vmem>>, vector<2x128xf32>,
    %c0_17 = arith.constant 0 : index
    %c0_18 = arith.constant 0 : index
    %28 = vector.load %arg7[%c0_17, %c0_18] : memref<2x128xf32, #tpu.memory_space<vmem>>, vector<2x128xf32>
    %29 = arith.mulf %23, %19 : vector<2x16x128xf32>
    %cst_19 = arith.constant dense<0.000000e+00> : vector<2x128xf32>
    %30 = vector.multi_reduction <add>, %29, %cst_19 [1] : vector<2x16x128xf32> to vector<2x128xf32>
    %31 = arith.addf %28, %30 : vector<2x128xf32>
    %c0_20 = arith.constant 0 : index
    %c0_21 = arith.constant 0 : index
    %32 = vector.load %arg7[%c0_20, %c0_21] : memref<2x128xf32, #tpu.memory_space<vmem>>, vector<2x128xf32>
    tpu.vector_store %arg7[%c0_20, %c0_21], %31 {strides = array<i32>} : memref<2x128xf32, #tpu.memory_space<vmem>>, vector<2x128xf32>,
    %c0_i32_22 = arith.constant 0 : i32
    %33 = arith.cmpi eq, %arg1, %c0_i32_22 : i32
    %34 = arith.extui %33 : i1 to i32
    %c0_i32_23 = arith.constant 0 : i32
    %35 = arith.cmpi ne, %34, %c0_i32_23 : i32
    scf.if %35 {
      %c0_24 = arith.constant 0 : index
      %c0_25 = arith.constant 0 : index
      %36 = vector.load %arg7[%c0_24, %c0_25] : memref<2x128xf32, #tpu.memory_space<vmem>>, vector<2x128xf32>
      %c0_26 = arith.constant 0 : index
      %c0_27 = arith.constant 0 : index
      %37 = vector.load %arg6[%c0_26, %c0_27] : memref<2x128xf32, #tpu.memory_space<vmem>>, vector<2x128xf32>
      %38 = tpu.reciprocal %37 {approx = true} : vector<2x128xf32> -> vector<2x128xf32>
      %39 = arith.mulf %36, %38 : vector<2x128xf32>
      %c0_28 = arith.constant 0 : index
      %c0_29 = arith.constant 0 : index
      %40 = vector.load %arg5[%c0_28, %c0_29] : memref<2x128xf32, #tpu.memory_space<vmem>>, vector<2x128xf32>
      tpu.vector_store %arg5[%c0_28, %c0_29], %39 {strides = array<i32>} : memref<2x128xf32, #tpu.memory_space<vmem>>, vector<2x128xf32>,
    } else {
    }
    return
  }
  func.func @transform_0(%arg0: i32, %arg1: i32) -> (i32, i32, i32) {
    %c0_i32 = arith.constant 0 : i32
    %c0_i32_0 = arith.constant 0 : i32
    return %arg0, %arg1, %c0_i32 : i32, i32, i32
  }
  func.func @transform_1(%arg0: i32, %arg1: i32) -> (i32, i32) {
    %c0_i32 = arith.constant 0 : i32
    %c0_i32_0 = arith.constant 0 : i32
    %c0_i32_1 = arith.constant 0 : i32
    return %c0_i32, %c0_i32_0 : i32, i32
  }
  func.func @transform_2(%arg0: i32, %arg1: i32) -> (i32, i32) {
    %c0_i32 = arith.constant 0 : i32
    %c0_i32_0 = arith.constant 0 : i32
    %c0_i32_1 = arith.constant 0 : i32
    return %c0_i32, %c0_i32_0 : i32, i32
  }
  func.func @transform_3(%arg0: i32, %arg1: i32) -> (i32, i32) {
    %c0_i32 = arith.constant 0 : i32
    %c0_i32_0 = arith.constant 0 : i32
    return %arg0, %c0_i32 : i32, i32
  }
}

</mosaic_0001>

<bundles_post_ra>
// kernel: tpu_custom_call.1
= control target key start
LH: loop header
LB: loop body
LE: loop exit
PB: predicated region body
PF: predicated region fallthrough
CT: control target
= control target key end

     0   :  { %8 = vsyncpa [#allocation5], 0  ;;  %s458_s0 = inlined_call_operand.hbm [shape: bf16[2,16,32], index: 0, kind: input, shape index: {}]   ;;  %s459_s1 = inlined_call_operand.hbm [shape: bf16[32,256], index: 1, kind: input, shape index: {}]   ;;  %s460_s2 = inlined_call_operand.vmem [shape: f32[1,256], index: 2, kind: input, shape index: {}]   ;;  %s461_s3 = inlined_call_operand.hbm [shape: f32[2,128], index: 3, kind: output, shape index: {}]  }
   0x1   :  { %9 = vsyncpa [#allocation8], 0 }
   0x2   :  { %10 = vsyncpa [#allocation6], 0  ;;  %s390_s12 = smov [#allocation4]   ;;  %s318_s16 = scalar_lea.hbm %s458_s0, 256 }
   0x3   :  { %s16_s13 = sshll.u32 %s390_s12, 4  ;;  %p319_p0 = scmp.ne.s32.totalorder %s458_s0, %s318_s16  ;;  %s17_s13 = int_to_ptr.vmem [resolvable:$true] %s16_s13 }
   0x4   :  { %p322_p1 = scmp.lt.u32.totalorder %s318_s16, %s458_s0 }
   0x6   :  { %p324_p2 = pnand %p322_p1, %p319_p0 }
   0x8   :  { %327 = shalt.err (!%p324_p2)
}
   0x9   :  { %s328_s21 = scalar_lea.vmem %s17_s13, 256  ;;  %p333_p4 = scmp.lt.s32.totalorder %s17_s13, %s17_s13 }
   0xa   :  { %p329_p3 = scmp.ne.s32.totalorder %s17_s13, %s328_s21  ;;  %p334_p5 = scmp.lt.s32.totalorder %s328_s21, %s328_s21 }
   0xc   :  { %p335_p6 = por %p334_p5, %p333_p4 }
   0xe   :  { %p336_p7 = pnand %p335_p6, %p329_p3 }
  0x10   :  { %339 = shalt.err (!%p336_p7)
}
  0x11   :  { %s391_s22 = smov 64   ;;  %s392_s23 = smov 4  }
  0x12   :  { %22 = dma.hbm_to_vmem [thread:$0]  %s458_s0, 256, %s17_s13, [#allocation5], %s391_s22, %s391_s22, %s392_s23  }
  0x13   :  { %s393_s26 = smov [#allocation7]   ;;  %s340_s30 = scalar_lea.hbm %s459_s1, 512 }
  0x14   :  { %s28_s27 = sshll.u32 %s393_s26, 4  ;;  %p341_p8 = scmp.ne.s32.totalorder %s459_s1, %s340_s30  ;;  %s29_s27 = int_to_ptr.vmem [resolvable:$true] %s28_s27 }
  0x15   :  { %p344_p9 = scmp.lt.u32.totalorder %s340_s30, %s459_s1 }
  0x17   :  { %p346_p10 = pnand %p344_p9, %p341_p8 }
  0x19   :  { %349 = shalt.err (!%p346_p10)
}
  0x1a   :  { %s350_s8 = scalar_lea.vmem %s29_s27, 512  ;;  %p355_p12 = scmp.lt.s32.totalorder %s29_s27, %s29_s27 }
  0x1b   :  { %p351_p11 = scmp.ne.s32.totalorder %s29_s27, %s350_s8  ;;  %p356_p13 = scmp.lt.s32.totalorder %s350_s8, %s350_s8 }
  0x1d   :  { %p357_p0 = por %p356_p13, %p355_p12 }
  0x1f   :  { %p358_p1 = pnand %p357_p0, %p351_p11 }
  0x21   :  { %361 = shalt.err (!%p358_p1)
}
  0x22   :  { %s394_s0 = smov 128   ;;  %s395_s9 = smov 8  }
  0x23   :  { %34 = dma.hbm_to_vmem [thread:$0]  %s459_s1, 512, %s29_s27, [#allocation8], %s394_s0, %s394_s0, %s395_s9  }
  0x24   :  { %384 = dma.done.wait [#allocation5], 256  }
  0x25   :  { %385 = vsyncadd [#allocation5], 4294967040 }
  0x26   :  { %386 = dma.done.wait [#allocation8], 512  }
  0x27   :  { %387 = vsyncadd [#allocation8], 4294966784  ;;  %v396_v0 = vmov 0   ;;  %v292_v1 = vld [vmem:[#allocation7 + $0x4] ss:$8 sps:$4 sm:$0xff]   ;;  %v298_v5 = vld [vmem:[#allocation4] sm:$0xff]   ;;  %v60_v8 = vlaneseq }
  0x28   :  { %139 = vmatprep.mubr.bf16.mxu0 %v396_v0  ;;  %149 = vmatprep.mubr.bf16.mxu1 %v396_v0  ;;  %v294_v2 = vld [vmem:[#allocation7] ss:$8 sps:$4 sm:$0xff]   ;;  %v295_v3 = vld [vmem:[#allocation7 + $0x14] ss:$8 sps:$4 sm:$0xff]   ;;  %v297_v4 = vld [vmem:[#allocation7 + $0x10] ss:$8 sps:$4 sm:$0xff]  }
  0x29   :  { %107 = vmatprep.subr.bf16.mxu0 %v292_v1  ;;  %279 = vmatprep.subr.bf16.mxu1 %v292_v1  ;;  %v299_v6 = vld [vmem:[#allocation4 + $0x8] sm:$0xff]   ;;  %vm100_vm0 = vcmask 261120   ;;  %v397_v7 = vmov 0.0   ;;  %v61_v9 = vshrl.u32 %v60_v8, 7  ;;  %v58_v11 = vld [vmem:[%s460_s2] sm:$0x3] }
  0x2a   :  { %108 = vmatpush1.bf16.msra.mxu0 %v294_v2  ;;  %281 = vmatpush1.bf16.msra.mxu1 %v294_v2  ;;  %48 = vst [vmem:[#allocation2] sm:$0x3] %v397_v7  ;;  %49 = vst [vmem:[#allocation3] sm:$0x3] %v397_v7  ;;  %vm217_vm1 = vcmask 1041409   ;;  %s398_s2 = smov [#allocation9]  }
  0x2b   :  { %109 = vmatprep.subr.bf16.mxu0 %v295_v3  ;;  %280 = vmatprep.subr.bf16.mxu1 %v295_v3  ;;  %v62_v10 = vsub.s32 0, %v61_v9  ;;  %v66_v12 = vsub.s32 1, %v61_v9  ;;  %s261_s13 = sshll.u32 %s398_s2, 4  ;;  %s262_s13 = int_to_ptr.vmem [resolvable:$true] %s261_s13 }
  0x2c   :  { %s362_s14 = scalar_lea.vmem %s262_s13, 32  ;;  %p367_p3 = scmp.lt.s32.totalorder %s262_s13, %s262_s13 }
  0x2d   :  { %v63_v13 = vrot.slane %v58_v11, %v62_v10  ;;  %v67_v14 = vrot.slane %v58_v11, %v66_v12  ;;  %p363_p2 = scmp.ne.s32.totalorder %s262_s13, %s362_s14  ;;  %p368_p4 = scmp.lt.s32.totalorder %s362_s14, %s362_s14 }
  0x2e   :  { %110 = vmatpush1.bf16.msra.mxu0 %v297_v4  ;;  %282 = vmatpush1.bf16.msra.mxu1 %v297_v4 }
  0x2f   :  { %p369_p5 = por %p368_p4, %p367_p3 }
  0x31   :  { %277 = vmatmul.mubr.msk.bf16.vlgmr.msra.gmra.mrb[0].mxu0 %vm100_vm0, %v298_v5  ;;  %278 = vmatmul.mubr.msk.bf16.vlgmr.msra.gmra.mrb[0].mxu1 %vm100_vm0, %v299_v6  ;;  %p370_p6 = pnand %p369_p5, %p363_p2 }
 0x104   :  { %v141_v15 = vpop.f32.mrb[0].mxu0  ;;  %v151_v16 = vpop.f32.mrb[0].mxu1 }
 0x105   :  { %v142_v17 = vadd.f32 %v141_v15, %v63_v13  ;;  %v152_v18 = vadd.f32 %v151_v16, %v63_v13  ;;  %v143_v19 = vpop.f32.mrb[1].mxu0  ;;  %v153_v20 = vpop.f32.mrb[1].mxu1 }
 0x106   :  { %v144_v21 = vadd.f32 %v143_v19, %v67_v14  ;;  %v154_v22 = vadd.f32 %v153_v20, %v67_v14  ;;  %v145_v23 = vpop.f32.mrb[2].mxu0  ;;  %v155_v24 = vpop.f32.mrb[2].mxu1 }
 0x107   :  { %v160_v25 = vmul.f32 0.5, %v142_v17  ;;  %v164_v26 = vmul.f32 0.5, %v152_v18  ;;  %v146_v27 = vadd.f32 %v145_v23, %v63_v13  ;;  %v156_v28 = vadd.f32 %v155_v24, %v63_v13  ;;  %v147_v29 = vpop.f32.mrb[3].mxu0  ;;  %v157_v30 = vpop.f32.mrb[3].mxu1 }
 0x108   :  { %v161_v31 = vmul.f32 0.5, %v144_v21  ;;  %v165_v32 = vmul.f32 0.5, %v154_v22  ;;  %v148_v33 = vadd.f32 %v147_v29, %v67_v14  ;;  %v158_v34 = vadd.f32 %v157_v30, %v67_v14 }
 0x109   :  { %300 = vtanh.f32 %v160_v25  ;;  %v162_v35 = vmul.f32 0.5, %v146_v27  ;;  %v166_v36 = vmul.f32 0.5, %v156_v28 }
 0x10a   :  { %302 = vtanh.f32 %v164_v26  ;;  %v163_v37 = vmul.f32 0.5, %v148_v33  ;;  %v167_v38 = vmul.f32 0.5, %v158_v34 }
 0x10b   :  { %304 = vtanh.f32 %v161_v31 }
 0x10c   :  { %306 = vtanh.f32 %v165_v32 }
 0x10d   :  { %308 = vtanh.f32 %v162_v35  ;;  %v200_v35 = vld [vmem:[#allocation2] sm:$0x3] }
 0x10e   :  { %310 = vtanh.f32 %v166_v36 }
 0x10f   :  { %312 = vtanh.f32 %v163_v37 }
 0x110   :  { %314 = vtanh.f32 %v167_v38 }
 0x113   :  { %v301_v39 = vpop.eup %300 }
 0x114   :  { %v303_v40 = vpop.eup %302  ;;  %v176_v41 = vmul.f32 0.5, %v301_v39 }
 0x115   :  { %v305_v42 = vpop.eup %304  ;;  %v180_v43 = vmul.f32 0.5, %v303_v40  ;;  %v222_v40 = vld [vmem:[#allocation3] sm:$0x3] }
 0x116   :  { %v307_v44 = vpop.eup %306  ;;  %v184_v45 = vadd.f32 0.5, %v176_v41  ;;  %v177_v46 = vmul.f32 0.5, %v305_v42 }
 0x117   :  { %v309_v47 = vpop.eup %308  ;;  %v188_v48 = vadd.f32 0.5, %v180_v43  ;;  %v181_v49 = vmul.f32 0.5, %v307_v44 }
 0x118   :  { %v311_v50 = vpop.eup %310  ;;  %v192_v51 = vmax.f32 %v184_v45, 1e-07  ;;  %v178_v52 = vmul.f32 0.5, %v309_v47  ;;  %v185_v58 = vadd.f32 0.5, %v177_v46 }
 0x119   :  { %v313_v53 = vpop.eup %312  ;;  %v194_v54 = vmax.f32 %v188_v48, 1e-07  ;;  %v182_v55 = vmul.f32 0.5, %v311_v50  ;;  %v189_v62 = vadd.f32 0.5, %v181_v49 }
 0x11a   :  { %v315_v56 = vpop.eup %314  ;;  %v196_v57 = vmin.f32 %v192_v51, 0.9999999  ;;  %v186_v59 = vadd.f32 0.5, %v178_v52  ;;  %v179_v60 = vmul.f32 0.5, %v313_v53 }
 0x11b   :  { %v198_v61 = vmin.f32 %v194_v54, 0.9999999  ;;  %v190_v63 = vadd.f32 0.5, %v182_v55  ;;  %v183_v0 = vmul.f32 0.5, %v315_v56 }
 0x11c   :  { %v223_v1 = vmul.f32 %v196_v57, %v185_v58  ;;  %v193_v2 = vmax.f32 %v186_v59, 1e-07  ;;  %v187_v6 = vadd.f32 0.5, %v179_v60 }
 0x11d   :  { %v225_v3 = vmul.f32 %v198_v61, %v189_v62  ;;  %v195_v4 = vmax.f32 %v190_v63, 1e-07  ;;  %v191_v8 = vadd.f32 0.5, %v183_v0 }
 0x11e   :  { %v197_v5 = vmin.f32 %v193_v2, 0.9999999 }
 0x11f   :  { %v199_v7 = vmin.f32 %v195_v4, 0.9999999 }
 0x120   :  { %v201_v9 = vadd.f32 %v197_v5, %v196_v57  ;;  %v224_v10 = vmul.f32 %v197_v5, %v187_v6 }
 0x121   :  { %v208_v11 = vadd.f32 %v199_v7, %v198_v61  ;;  %v226_v12 = vmul.f32 %v199_v7, %v191_v8 }
 0x122   :  { %v202_v13 = vrot.slane %v201_v9, 4  ;;  %v227_v14 = vadd.f32 %v224_v10, %v223_v1 }
 0x123   :  { %v209_v15 = vrot.slane %v208_v11, 4  ;;  %v234_v16 = vadd.f32 %v226_v12, %v225_v3 }
 0x124   :  { %v203_v17 = vadd.f32 %v202_v13, %v201_v9  ;;  %v228_v18 = vrot.slane %v227_v14, 4 }
 0x125   :  { %v210_v19 = vadd.f32 %v209_v15, %v208_v11  ;;  %v235_v20 = vrot.slane %v234_v16, 4 }
 0x126   :  { %v204_v21 = vrot.slane %v203_v17, 2  ;;  %v229_v22 = vadd.f32 %v228_v18, %v227_v14 }
 0x127   :  { %v211_v23 = vrot.slane %v210_v19, 2  ;;  %v236_v24 = vadd.f32 %v235_v20, %v234_v16 }
 0x128   :  { %v205_v25 = vadd.f32 %v204_v21, %v203_v17  ;;  %v230_v26 = vrot.slane %v229_v22, 2 }
 0x129   :  { %v212_v27 = vadd.f32 %v211_v23, %v210_v19  ;;  %v237_v28 = vrot.slane %v236_v24, 2 }
 0x12a   :  { %v206_v29 = vrot.slane %v205_v25, 1  ;;  %v231_v30 = vadd.f32 %v230_v26, %v229_v22 }
 0x12b   :  { %v213_v31 = vrot.slane %v212_v27, 1  ;;  %v238_v32 = vadd.f32 %v237_v28, %v236_v24 }
 0x12c   :  { %v207_v33 = vadd.f32 %v206_v29, %v205_v25  ;;  %v232_v34 = vrot.slane %v231_v30, 1 }
 0x12d   :  { %v214_v36 = vadd.f32 %v213_v31, %v212_v27  ;;  %v239_v37 = vrot.slane %v238_v32, 1 }
 0x12e   :  { %v233_v38 = vadd.f32 %v232_v34, %v231_v30 }
 0x12f   :  { %v218_v39 = vsel %vm217_vm1, %v214_v36, %v207_v33  ;;  %v240_v41 = vadd.f32 %v239_v37, %v238_v32 }
 0x130   :  { %v220_v42 = vadd.f32 %v218_v39, %v200_v35 }
 0x131   :  { %v243_v43 = vsel %vm217_vm1, %v240_v41, %v233_v38 }
 0x132   :  { %221 = vst [vmem:[#allocation2] sm:$0x3] %v220_v42  ;;  %v245_v44 = vadd.f32 %v243_v43, %v222_v40 }
 0x134   :  { %246 = vst [vmem:[#allocation3] sm:$0x3] %v245_v44 }
 0x139   :  { %v251_v45 = vld [vmem:[#allocation2] sm:$0x3] }
 0x13a   :  { %316 = vrcp.f32 %v251_v45 }
 0x13b   :  { %v250_v47 = vld [vmem:[#allocation3] sm:$0x3] }
 0x144   :  { %v317_v46 = vpop.eup %316 }
 0x145   :  { %v253_v48 = vmul.f32 %v317_v46, %v250_v47 }
 0x147   :  { %254 = vst [vmem:[#allocation9] sm:$0x3] %v253_v48 }
 0x148   :  { %373 = shalt.err (!%p370_p6)
}
 0x149   :  { %s374_s17 = scalar_lea.hbm %s461_s3, 32 }
 0x14a   :  { %p375_p7 = scmp.ne.s32.totalorder %s461_s3, %s374_s17  ;;  %p378_p8 = scmp.lt.u32.totalorder %s374_s17, %s461_s3 }
 0x14c   :  { %p380_p9 = pnand %p378_p8, %p375_p7 }
 0x14e   :  { %383 = shalt.err (!%p380_p9)
}
 0x14f   :  { %264 = dma.vmem_to_hbm [thread:$0]  %s262_s13, 32, %s461_s3, [#allocation6]  }
 0x150   :  { %388 = dma.done.wait [#allocation6], 32  }
 0x151   :  { %389 = vsyncadd [#allocation6], 4294967264 }
 0x152   :  { %268 = vsyncpa [#allocation5], 1 }
 0x153   :  { %269 = vsyncpa [#allocation8], 1 }
 0x154   :  { %270 = vsyncpa [#allocation6], 1 }

// kernel: tpu_custom_call.1
= control target key start
LH: loop header
LB: loop body
LE: loop exit
PB: predicated region body
PF: predicated region fallthrough
CT: control target
= control target key end

     0   :  { %8 = vsyncpa [#allocation5], 0  ;;  %s458_s0 = inlined_call_operand.hbm [shape: bf16[2,16,32], index: 0, kind: input, shape index: {}]   ;;  %s459_s1 = inlined_call_operand.hbm [shape: bf16[32,256], index: 1, kind: input, shape index: {}]   ;;  %s460_s2 = inlined_call_operand.vmem [shape: f32[1,256], index: 2, kind: input, shape index: {}]   ;;  %s461_s3 = inlined_call_operand.hbm [shape: f32[2,128], index: 3, kind: output, shape index: {}]  }
   0x1   :  { %9 = vsyncpa [#allocation8], 0 }
   0x2   :  { %10 = vsyncpa [#allocation6], 0  ;;  %s390_s12 = smov [#allocation4]   ;;  %s318_s16 = scalar_lea.hbm %s458_s0, 256 }
   0x3   :  { %s16_s13 = sshll.u32 %s390_s12, 4  ;;  %p319_p0 = scmp.ne.s32.totalorder %s458_s0, %s318_s16  ;;  %s17_s13 = int_to_ptr.vmem [resolvable:$true] %s16_s13 }
   0x4   :  { %p322_p1 = scmp.lt.u32.totalorder %s318_s16, %s458_s0 }
   0x6   :  { %p324_p2 = pnand %p322_p1, %p319_p0 }
   0x8   :  { %327 = shalt.err (!%p324_p2)
}
   0x9   :  { %s328_s21 = scalar_lea.vmem %s17_s13, 256  ;;  %p333_p4 = scmp.lt.s32.totalorder %s17_s13, %s17_s13 }
   0xa   :  { %p329_p3 = scmp.ne.s32.totalorder %s17_s13, %s328_s21  ;;  %p334_p5 = scmp.lt.s32.totalorder %s328_s21, %s328_s21 }
   0xc   :  { %p335_p6 = por %p334_p5, %p333_p4 }
   0xe   :  { %p336_p7 = pnand %p335_p6, %p329_p3 }
  0x10   :  { %339 = shalt.err (!%p336_p7)
}
  0x11   :  { %s391_s22 = smov 64   ;;  %s392_s23 = smov 4  }
  0x12   :  { %22 = dma.hbm_to_vmem [thread:$0]  %s458_s0, 256, %s17_s13, [#allocation5], %s391_s22, %s391_s22, %s392_s23  }
  0x13   :  { %s393_s26 = smov [#allocation7]   ;;  %s340_s30 = scalar_lea.hbm %s459_s1, 512 }
  0x14   :  { %s28_s27 = sshll.u32 %s393_s26, 4  ;;  %p341_p8 = scmp.ne.s32.totalorder %s459_s1, %s340_s30  ;;  %s29_s27 = int_to_ptr.vmem [resolvable:$true] %s28_s27 }
  0x15   :  { %p344_p9 = scmp.lt.u32.totalorder %s340_s30, %s459_s1 }
  0x17   :  { %p346_p10 = pnand %p344_p9, %p341_p8 }
  0x19   :  { %349 = shalt.err (!%p346_p10)
}
  0x1a   :  { %s350_s8 = scalar_lea.vmem %s29_s27, 512  ;;  %p355_p12 = scmp.lt.s32.totalorder %s29_s27, %s29_s27 }
  0x1b   :  { %p351_p11 = scmp.ne.s32.totalorder %s29_s27, %s350_s8  ;;  %p356_p13 = scmp.lt.s32.totalorder %s350_s8, %s350_s8 }
  0x1d   :  { %p357_p0 = por %p356_p13, %p355_p12 }
  0x1f   :  { %p358_p1 = pnand %p357_p0, %p351_p11 }
  0x21   :  { %361 = shalt.err (!%p358_p1)
}
  0x22   :  { %s394_s0 = smov 128   ;;  %s395_s9 = smov 8  }
  0x23   :  { %34 = dma.hbm_to_vmem [thread:$0]  %s459_s1, 512, %s29_s27, [#allocation8], %s394_s0, %s394_s0, %s395_s9  }
  0x24   :  { %384 = dma.done.wait [#allocation5], 256  }
  0x25   :  { %385 = vsyncadd [#allocation5], 4294967040 }
  0x26   :  { %386 = dma.done.wait [#allocation8], 512  }
  0x27   :  { %387 = vsyncadd [#allocation8], 4294966784  ;;  %v396_v0 = vmov 0   ;;  %v292_v1 = vld [vmem:[#allocation7 + $0x4] ss:$8 sps:$4 sm:$0xff]   ;;  %v298_v5 = vld [vmem:[#allocation4] sm:$0xff]   ;;  %v60_v8 = vlaneseq }
  0x28   :  { %139 = vmatprep.mubr.bf16.mxu0 %v396_v0  ;;  %149 = vmatprep.mubr.bf16.mxu1 %v396_v0  ;;  %v294_v2 = vld [vmem:[#allocation7] ss:$8 sps:$4 sm:$0xff]   ;;  %v295_v3 = vld [vmem:[#allocation7 + $0x14] ss:$8 sps:$4 sm:$0xff]   ;;  %v297_v4 = vld [vmem:[#allocation7 + $0x10] ss:$8 sps:$4 sm:$0xff]  }
  0x29   :  { %107 = vmatprep.subr.bf16.mxu0 %v292_v1  ;;  %279 = vmatprep.subr.bf16.mxu1 %v292_v1  ;;  %v299_v6 = vld [vmem:[#allocation4 + $0x8] sm:$0xff]   ;;  %vm100_vm0 = vcmask 261120   ;;  %v397_v7 = vmov 0.0   ;;  %v61_v9 = vshrl.u32 %v60_v8, 7  ;;  %v58_v11 = vld [vmem:[%s460_s2] sm:$0x3] }
  0x2a   :  { %108 = vmatpush1.bf16.msra.mxu0 %v294_v2  ;;  %281 = vmatpush1.bf16.msra.mxu1 %v294_v2  ;;  %48 = vst [vmem:[#allocation2] sm:$0x3] %v397_v7  ;;  %49 = vst [vmem:[#allocation3] sm:$0x3] %v397_v7  ;;  %vm217_vm1 = vcmask 1041409   ;;  %s398_s2 = smov [#allocation9]  }
  0x2b   :  { %109 = vmatprep.subr.bf16.mxu0 %v295_v3  ;;  %280 = vmatprep.subr.bf16.mxu1 %v295_v3  ;;  %v62_v10 = vsub.s32 0, %v61_v9  ;;  %v66_v12 = vsub.s32 1, %v61_v9  ;;  %s261_s13 = sshll.u32 %s398_s2, 4  ;;  %s262_s13 = int_to_ptr.vmem [resolvable:$true] %s261_s13 }
  0x2c   :  { %s362_s14 = scalar_lea.vmem %s262_s13, 32  ;;  %p367_p3 = scmp.lt.s32.totalorder %s262_s13, %s262_s13 }
  0x2d   :  { %v63_v13 = vrot.slane %v58_v11, %v62_v10  ;;  %v67_v14 = vrot.slane %v58_v11, %v66_v12  ;;  %p363_p2 = scmp.ne.s32.totalorder %s262_s13, %s362_s14  ;;  %p368_p4 = scmp.lt.s32.totalorder %s362_s14, %s362_s14 }
  0x2e   :  { %110 = vmatpush1.bf16.msra.mxu0 %v297_v4  ;;  %282 = vmatpush1.bf16.msra.mxu1 %v297_v4 }
  0x2f   :  { %p369_p5 = por %p368_p4, %p367_p3 }
  0x31   :  { %277 = vmatmul.mubr.msk.bf16.vlgmr.msra.gmra.mrb[0].mxu0 %vm100_vm0, %v298_v5  ;;  %278 = vmatmul.mubr.msk.bf16.vlgmr.msra.gmra.mrb[0].mxu1 %vm100_vm0, %v299_v6  ;;  %p370_p6 = pnand %p369_p5, %p363_p2 }
 0x104   :  { %v141_v15 = vpop.f32.mrb[0].mxu0  ;;  %v151_v16 = vpop.f32.mrb[0].mxu1 }
 0x105   :  { %v142_v17 = vadd.f32 %v141_v15, %v63_v13  ;;  %v152_v18 = vadd.f32 %v151_v16, %v63_v13  ;;  %v143_v19 = vpop.f32.mrb[1].mxu0  ;;  %v153_v20 = vpop.f32.mrb[1].mxu1 }
 0x106   :  { %v144_v21 = vadd.f32 %v143_v19, %v67_v14  ;;  %v154_v22 = vadd.f32 %v153_v20, %v67_v14  ;;  %v145_v23 = vpop.f32.mrb[2].mxu0  ;;  %v155_v24 = vpop.f32.mrb[2].mxu1 }
 0x107   :  { %v160_v25 = vmul.f32 0.5, %v142_v17  ;;  %v164_v26 = vmul.f32 0.5, %v152_v18  ;;  %v146_v27 = vadd.f32 %v145_v23, %v63_v13  ;;  %v156_v28 = vadd.f32 %v155_v24, %v63_v13  ;;  %v147_v29 = vpop.f32.mrb[3].mxu0  ;;  %v157_v30 = vpop.f32.mrb[3].mxu1 }
 0x108   :  { %v161_v31 = vmul.f32 0.5, %v144_v21  ;;  %v165_v32 = vmul.f32 0.5, %v154_v22  ;;  %v148_v33 = vadd.f32 %v147_v29, %v67_v14  ;;  %v158_v34 = vadd.f32 %v157_v30, %v67_v14 }
 0x109   :  { %300 = vtanh.f32 %v160_v25  ;;  %v162_v35 = vmul.f32 0.5, %v146_v27  ;;  %v166_v36 = vmul.f32 0.5, %v156_v28 }
 0x10a   :  { %302 = vtanh.f32 %v164_v26  ;;  %v163_v37 = vmul.f32 0.5, %v148_v33  ;;  %v167_v38 = vmul.f32 0.5, %v158_v34 }
 0x10b   :  { %304 = vtanh.f32 %v161_v31 }
 0x10c   :  { %306 = vtanh.f32 %v165_v32 }
 0x10d   :  { %308 = vtanh.f32 %v162_v35  ;;  %v200_v35 = vld [vmem:[#allocation2] sm:$0x3] }
 0x10e   :  { %310 = vtanh.f32 %v166_v36 }
 0x10f   :  { %312 = vtanh.f32 %v163_v37 }
 0x110   :  { %314 = vtanh.f32 %v167_v38 }
 0x113   :  { %v301_v39 = vpop.eup %300 }
 0x114   :  { %v303_v40 = vpop.eup %302  ;;  %v176_v41 = vmul.f32 0.5, %v301_v39 }
 0x115   :  { %v305_v42 = vpop.eup %304  ;;  %v180_v43 = vmul.f32 0.5, %v303_v40  ;;  %v222_v40 = vld [vmem:[#allocation3] sm:$0x3] }
 0x116   :  { %v307_v44 = vpop.eup %306  ;;  %v184_v45 = vadd.f32 0.5, %v176_v41  ;;  %v177_v46 = vmul.f32 0.5, %v305_v42 }
 0x117   :  { %v309_v47 = vpop.eup %308  ;;  %v188_v48 = vadd.f32 0.5, %v180_v43  ;;  %v181_v49 = vmul.f32 0.5, %v307_v44 }
 0x118   :  { %v311_v50 = vpop.eup %310  ;;  %v192_v51 = vmax.f32 %v184_v45, 1e-07  ;;  %v178_v52 = vmul.f32 0.5, %v309_v47  ;;  %v185_v58 = vadd.f32 0.5, %v177_v46 }
 0x119   :  { %v313_v53 = vpop.eup %312  ;;  %v194_v54 = vmax.f32 %v188_v48, 1e-07  ;;  %v182_v55 = vmul.f32 0.5, %v311_v50  ;;  %v189_v62 = vadd.f32 0.5, %v181_v49 }
 0x11a   :  { %v315_v56 = vpop.eup %314  ;;  %v196_v57 = vmin.f32 %v192_v51, 0.9999999  ;;  %v186_v59 = vadd.f32 0.5, %v178_v52  ;;  %v179_v60 = vmul.f32 0.5, %v313_v53 }
 0x11b   :  { %v198_v61 = vmin.f32 %v194_v54, 0.9999999  ;;  %v190_v63 = vadd.f32 0.5, %v182_v55  ;;  %v183_v0 = vmul.f32 0.5, %v315_v56 }
 0x11c   :  { %v223_v1 = vmul.f32 %v196_v57, %v185_v58  ;;  %v193_v2 = vmax.f32 %v186_v59, 1e-07  ;;  %v187_v6 = vadd.f32 0.5, %v179_v60 }
 0x11d   :  { %v225_v3 = vmul.f32 %v198_v61, %v189_v62  ;;  %v195_v4 = vmax.f32 %v190_v63, 1e-07  ;;  %v191_v8 = vadd.f32 0.5, %v183_v0 }
 0x11e   :  { %v197_v5 = vmin.f32 %v193_v2, 0.9999999 }
 0x11f   :  { %v199_v7 = vmin.f32 %v195_v4, 0.9999999 }
 0x120   :  { %v201_v9 = vadd.f32 %v197_v5, %v196_v57  ;;  %v224_v10 = vmul.f32 %v197_v5, %v187_v6 }
 0x121   :  { %v208_v11 = vadd.f32 %v199_v7, %v198_v61  ;;  %v226_v12 = vmul.f32 %v199_v7, %v191_v8 }
 0x122   :  { %v202_v13 = vrot.slane %v201_v9, 4  ;;  %v227_v14 = vadd.f32 %v224_v10, %v223_v1 }
 0x123   :  { %v209_v15 = vrot.slane %v208_v11, 4  ;;  %v234_v16 = vadd.f32 %v226_v12, %v225_v3 }
 0x124   :  { %v203_v17 = vadd.f32 %v202_v13, %v201_v9  ;;  %v228_v18 = vrot.slane %v227_v14, 4 }
 0x125   :  { %v210_v19 = vadd.f32 %v209_v15, %v208_v11  ;;  %v235_v20 = vrot.slane %v234_v16, 4 }
 0x126   :  { %v204_v21 = vrot.slane %v203_v17, 2  ;;  %v229_v22 = vadd.f32 %v228_v18, %v227_v14 }
 0x127   :  { %v211_v23 = vrot.slane %v210_v19, 2  ;;  %v236_v24 = vadd.f32 %v235_v20, %v234_v16 }
 0x128   :  { %v205_v25 = vadd.f32 %v204_v21, %v203_v17  ;;  %v230_v26 = vrot.slane %v229_v22, 2 }
 0x129   :  { %v212_v27 = vadd.f32 %v211_v23, %v210_v19  ;;  %v237_v28 = vrot.slane %v236_v24, 2 }
 0x12a   :  { %v206_v29 = vrot.slane %v205_v25, 1  ;;  %v231_v30 = vadd.f32 %v230_v26, %v229_v22 }
 0x12b   :  { %v213_v31 = vrot.slane %v212_v27, 1  ;;  %v238_v32 = vadd.f32 %v237_v28, %v236_v24 }
 0x12c   :  { %v207_v33 = vadd.f32 %v206_v29, %v205_v25  ;;  %v232_v34 = vrot.slane %v231_v30, 1 }
 0x12d   :  { %v214_v36 = vadd.f32 %v213_v31, %v212_v27  ;;  %v239_v37 = vrot.slane %v238_v32, 1 }
 0x12e   :  { %v233_v38 = vadd.f32 %v232_v34, %v231_v30 }
 0x12f   :  { %v218_v39 = vsel %vm217_vm1, %v214_v36, %v207_v33  ;;  %v240_v41 = vadd.f32 %v239_v37, %v238_v32 }
 0x130   :  { %v220_v42 = vadd.f32 %v218_v39, %v200_v35 }
 0x131   :  { %v243_v43 = vsel %vm217_vm1, %v240_v41, %v233_v38 }
 0x132   :  { %221 = vst [vmem:[#allocation2] sm:$0x3] %v220_v42  ;;  %v245_v44 = vadd.f32 %v243_v43, %v222_v40 }
 0x134   :  { %246 = vst [vmem:[#allocation3] sm:$0x3] %v245_v44 }
 0x139   :  { %v251_v45 = vld [vmem:[#allocation2] sm:$0x3] }
 0x13a   :  { %316 = vrcp.f32 %v251_v45 }
 0x13b   :  { %v250_v47 = vld [vmem:[#allocation3] sm:$0x3] }
 0x144   :  { %v317_v46 = vpop.eup %316 }
 0x145   :  { %v253_v48 = vmul.f32 %v317_v46, %v250_v47 }
 0x147   :  { %254 = vst [vmem:[#allocation9] sm:$0x3] %v253_v48 }
 0x148   :  { %373 = shalt.err (!%p370_p6)
}
 0x149   :  { %s374_s17 = scalar_lea.hbm %s461_s3, 32 }
 0x14a   :  { %p375_p7 = scmp.ne.s32.totalorder %s461_s3, %s374_s17  ;;  %p378_p8 = scmp.lt.u32.totalorder %s374_s17, %s461_s3 }
 0x14c   :  { %p380_p9 = pnand %p378_p8, %p375_p7 }
 0x14e   :  { %383 = shalt.err (!%p380_p9)
}
 0x14f   :  { %264 = dma.vmem_to_hbm [thread:$0]  %s262_s13, 32, %s461_s3, [#allocation6]  }
 0x150   :  { %388 = dma.done.wait [#allocation6], 32  }
 0x151   :  { %389 = vsyncadd [#allocation6], 4294967264 }
 0x152   :  { %268 = vsyncpa [#allocation5], 1 }
 0x153   :  { %269 = vsyncpa [#allocation8], 1 }
 0x154   :  { %270 = vsyncpa [#allocation6], 1 }

</bundles_post_ra>
